<compile_context>
chip_gen: v7x
topology: tpu7x:2x2x1
jax: 0.10.0
libtpu: 0.0.40
codegen_flags: <defaults>
</compile_context>

<pallas_src>
import functools

import jax
import jax.numpy as jnp
from jax import lax
from jax.experimental import pallas as pl
from jax.experimental.pallas import tpu as pltpu

EPS = 1e-3


def _mono_kernel(x_ref, w_ref, gb_ref, o_ref):
    """Single-block kernel: x (Cin, M), w (Cout, Cin), gb (Cout, 2) -> o (Cout, M)."""
    x = x_ref[...]
    w = w_ref[...]
    # 1x1 conv == (Cout, Cin) @ (Cin, M) on the MXU.
    y = jnp.dot(w, x, preferred_element_type=jnp.float32)          # (Cout, M)

    # Training-mode BN stats, two-pass (numerically safe; y is VMEM-resident).
    inv_m = 1.0 / y.shape[1]
    mean = jnp.sum(y, axis=1, keepdims=True) * inv_m                # (Cout, 1)
    yc = y - mean
    var = jnp.sum(yc * yc, axis=1, keepdims=True) * inv_m           # (Cout, 1)

    gamma = gb_ref[:, 0:1]
    beta = gb_ref[:, 1:2]
    a = gamma * lax.rsqrt(var + EPS)
    o_ref[...] = (yc * a + beta).astype(o_ref.dtype)


def _gridded_kernel(x_ref, w_ref, gb_ref, o_ref, sum_ref, ssq_ref, *, inv_count):
    """Two-phase streaming kernel.

    grid = (2, N, num_m_tiles), all axes sequential ("arbitrary").
      phase 0: accumulate per-channel sum / sum-of-squares of y = w @ x.
      phase 1: recompute y per tile (matmul is ~2*Cout*Cin flops/element,
               negligible next to the HBM stream) and write the normalized
               output.
    x_ref: (Cin, TM) tile, o_ref: (Cout, TM) tile,
    sum_ref/ssq_ref: (Cout, 1) persistent VMEM scratch.
    """
    phase = pl.program_id(0)
    n = pl.program_id(1)
    j = pl.program_id(2)

    @pl.when(jnp.logical_and(phase == 0, jnp.logical_and(n == 0, j == 0)))
    def _init():
        sum_ref[...] = jnp.zeros_like(sum_ref)
        ssq_ref[...] = jnp.zeros_like(ssq_ref)

    y = jnp.dot(w_ref[...], x_ref[...], preferred_element_type=jnp.float32)

    @pl.when(phase == 0)
    def _accumulate():
        sum_ref[...] += jnp.sum(y, axis=1, keepdims=True)
        ssq_ref[...] += jnp.sum(y * y, axis=1, keepdims=True)
        # o_ref intentionally not written in phase 0; phase 1 overwrites the
        # same HBM region with the normalized result.

    @pl.when(phase == 1)
    def _normalize():
        mean = sum_ref[...] * inv_count
        var = ssq_ref[...] * inv_count - mean * mean
        gamma = gb_ref[:, 0:1]
        beta = gb_ref[:, 1:2]
        a = gamma * lax.rsqrt(var + EPS)
        b = beta - mean * a
        o_ref[...] = (y * a + b).astype(o_ref.dtype)


def fused_scale_conv1x1_bn(x_nchw, scale_nc11, weight_oi11, gamma, beta, *,
                           vmem_budget_bytes=40 * 1024 * 1024,
                           force_tile_m=None):
    """x_nchw: (N, Cin, H, W), scale_nc11: (1, Cin, 1, 1),
    weight_oi11: (Cout, Cin, 1, 1), gamma/beta: (Cout,)."""
    N, Cin, H, W = x_nchw.shape
    Cout = weight_oi11.shape[0]
    HW = H * W
    M = N * HW
    dtype = x_nchw.dtype

    # Fold the per-channel scale (x113) into the tiny conv weight.
    w2d = (weight_oi11.reshape(Cout, Cin)
           * scale_nc11.reshape(1, Cin)).astype(jnp.float32)
    # Single merged (Cout, 2) gamma/beta operand -> one tiny DMA.
    gb = jnp.stack([gamma, beta], axis=1).astype(jnp.float32)

    cost_mono = pl.CostEstimate(
        flops=2 * Cout * Cin * M,
        transcendentals=Cout,
        bytes_accessed=(Cin * M + Cout * M + Cout * Cin + 2 * Cout) * 4,
    )

    mono_bytes = (Cin + Cout) * M * 4        # x block + out block, single copy
    use_mono = (force_tile_m is None and N == 1
                and 2 * mono_bytes + (4 << 20) <= vmem_budget_bytes)

    if use_mono:
        # (1, Cin, H, W) -> (Cin, M): free reshape, no transpose / moveaxis.
        x2d = x_nchw.reshape(Cin, M)
        vmem_limit = int(max(32 << 20, 2 * mono_bytes + (4 << 20)))
        out2d = pl.pallas_call(
            _mono_kernel,
            out_shape=jax.ShapeDtypeStruct((Cout, M), dtype),
            in_specs=[
                pl.BlockSpec((Cin, M), lambda: (0, 0)),
                pl.BlockSpec((Cout, Cin), lambda: (0, 0)),
                pl.BlockSpec((Cout, 2), lambda: (0, 0)),
            ],
            out_specs=pl.BlockSpec((Cout, M), lambda: (0, 0)),
            compiler_params=pltpu.CompilerParams(vmem_limit_bytes=vmem_limit),
            cost_estimate=cost_mono,
        )(x2d, w2d, gb)
        return out2d.reshape(1, Cout, H, W)

    # ---- gridded two-phase path (large M and/or batched N > 1) -------------
    # x stays (N, Cin, HW): a free reshape of NCHW, no moveaxis HBM round trip.
    x3d = x_nchw.reshape(N, Cin, HW)

    if force_tile_m is not None:
        tm = int(force_tile_m)
        assert tm % 128 == 0, "force_tile_m must be a multiple of 128"
    else:
        per_col = (Cin + Cout) * 4 * 2        # double-buffered input + output
        max_cols = max(128, (vmem_budget_bytes - (4 << 20)) // per_col)
        tm = min(pl.cdiv(HW, 128) * 128, (max_cols // 128) * 128)
        tm = max(tm, 128)
    hw_pad = pl.cdiv(HW, tm) * tm
    if hw_pad != HW:
        # Zero columns give y == 0, contributing nothing to sum / sumsq; the
        # statistics always divide by the TRUE element count M below.
        x3d = jnp.pad(x3d, ((0, 0), (0, 0), (0, hw_pad - HW)))
    num_mt = hw_pad // tm

    step_bytes = (Cin + Cout) * tm * 4 * 2
    vmem_limit = int(max(32 << 20, step_bytes + (4 << 20)))

    kernel = functools.partial(_gridded_kernel, inv_count=1.0 / float(M))
    out3d = pl.pallas_call(
        kernel,
        out_shape=jax.ShapeDtypeStruct((N, Cout, hw_pad), dtype),
        grid=(2, N, num_mt),
        in_specs=[
            pl.BlockSpec((None, Cin, tm), lambda p, n, j: (n, 0, j)),
            pl.BlockSpec((Cout, Cin), lambda p, n, j: (0, 0)),
            pl.BlockSpec((Cout, 2), lambda p, n, j: (0, 0)),
        ],
        out_specs=pl.BlockSpec((None, Cout, tm), lambda p, n, j: (n, 0, j)),
        scratch_shapes=[pltpu.VMEM((Cout, 1), jnp.float32),
                        pltpu.VMEM((Cout, 1), jnp.float32)],
        compiler_params=pltpu.CompilerParams(
            # Stats accumulate sequentially in per-core scratch, so every grid
            # axis must stay "arbitrary" (see TODO on 2-TC split at top).
            dimension_semantics=("arbitrary", "arbitrary", "arbitrary"),
            vmem_limit_bytes=vmem_limit,
        ),
        cost_estimate=pl.CostEstimate(
            flops=2 * 2 * Cout * Cin * M,      # y computed in both phases
            transcendentals=Cout,
            bytes_accessed=(2 * Cin * M + 2 * Cout * M
                            + Cout * Cin + 2 * Cout) * 4,
        ),
    )(x3d, w2d, gb)

    return out3d[:, :, :HW].reshape(N, Cout, H, W)


if __name__ == "__main__":
    key = jax.random.PRNGKey(0)
    k1, k2, k3, k4, k5, k6 = jax.random.split(key, 6)

    # Small shapes consistent with the module (channels fixed by the conv).
    N, Cin, H, W = 1, 240, 16, 16
    Cout = 40

    x108 = jax.random.normal(k1, (N, Cin, H, W), dtype=jnp.float32)
    x113 = jax.random.normal(k2, (1, Cin, 1, 1), dtype=jnp.float32)
    conv_w = jax.random.normal(k3, (Cout, Cin, 1, 1), dtype=jnp.float32) * 0.05
    gamma = 1.0 + 0.1 * jax.random.normal(k4, (Cout,), dtype=jnp.float32)
    beta = 0.1 * jax.random.normal(k5, (Cout,), dtype=jnp.float32)

    def reference(x, s, w, g, b):
        x114 = s * x
        y = jnp.einsum("nchw,oc->nohw", x114, w.reshape(Cout, Cin))
        m = jnp.mean(y, axis=(0, 2, 3), keepdims=True)
        v = jnp.mean((y - m) ** 2, axis=(0, 2, 3), keepdims=True)
        return ((y - m) / jnp.sqrt(v + EPS) * g.reshape(1, Cout, 1, 1)
                + b.reshape(1, Cout, 1, 1))

    # 1) Default path (monolithic single-block kernel at this size).
    out = jax.block_until_ready(
        fused_scale_conv1x1_bn(x108, x113, conv_w, gamma, beta))
    ref = reference(x108, x113, conv_w, gamma, beta)
    assert out.shape == (N, Cout, H, W)
    assert float(jnp.max(jnp.abs(out - ref))) < 1e-3

    # 2) Forced gridded two-phase path (exercises the large-M contingency).
    out_g = jax.block_until_ready(
        fused_scale_conv1x1_bn(x108, x113, conv_w, gamma, beta,
                               force_tile_m=128))
    assert float(jnp.max(jnp.abs(out_g - ref))) < 1e-3

    # 3) Batched input (N > 1) -> gridded path, no wrapper transposes.
    xb = jax.random.normal(k6, (2, Cin, H, W), dtype=jnp.float32)
    out_b = jax.block_until_ready(
        fused_scale_conv1x1_bn(xb, x113, conv_w, gamma, beta))
    ref_b = reference(xb, x113, conv_w, gamma, beta)
    assert out_b.shape == (2, Cout, H, W)
    assert float(jnp.max(jnp.abs(out_b - ref_b))) < 1e-3

    print("KERNEL_OK")
</pallas_src>

<mosaic_0001>
module attributes {stable_mosaic.version = 11 : i64} {
  func.func @_mono_kernel(%arg0: memref<240x256xf32, #tpu.memory_space<vmem>>, %arg1: memref<40x240xf32, #tpu.memory_space<vmem>>, %arg2: memref<40x2xf32, #tpu.memory_space<vmem>>, %arg3: memref<40x256xf32, #tpu.memory_space<vmem>>) attributes {dimension_semantics = [], scalar_prefetch = 0 : i64, scratch_operands = 0 : i64, tpu.core_type = #tpu.core_type<tc>} {
    %c0 = arith.constant 0 : index
    %c0_0 = arith.constant 0 : index
    %0 = vector.load %arg0[%c0, %c0_0] : memref<240x256xf32, #tpu.memory_space<vmem>>, vector<240x256xf32>
    %c0_1 = arith.constant 0 : index
    %c0_2 = arith.constant 0 : index
    %1 = vector.load %arg1[%c0_1, %c0_2] : memref<40x240xf32, #tpu.memory_space<vmem>>, vector<40x240xf32>
    %cst = arith.constant dense<0.000000e+00> : vector<40x256xf32>
    %2 = tpu.matmul %1, %0, %cst {dimension_numbers = #tpu.dot_dimension_numbers<[1], [0], [0], [1], [0, 0, 1, 1], [], []>} : vector<40x240xf32>, vector<240x256xf32>, vector<40x256xf32> -> vector<40x256xf32>
    %cst_3 = arith.constant dense<0.000000e+00> : vector<40xf32>
    %3 = vector.multi_reduction <add>, %2, %cst_3 [1] : vector<40x256xf32> to vector<40xf32>
    %4 = vector.shape_cast %3 : vector<40xf32> to vector<40x1xf32>
    %cst_4 = arith.constant 3.906250e-03 : f32
    %5 = vector.broadcast %cst_4 : f32 to vector<40x1xf32>
    %6 = arith.mulf %4, %5 : vector<40x1xf32>
    %7 = vector.broadcast %6 : vector<40x1xf32> to vector<40x256xf32>
    %8 = arith.subf %2, %7 : vector<40x256xf32>
    %9 = arith.mulf %8, %8 : vector<40x256xf32>
    %cst_5 = arith.constant dense<0.000000e+00> : vector<40xf32>
    %10 = vector.multi_reduction <add>, %9, %cst_5 [1] : vector<40x256xf32> to vector<40xf32>
    %11 = vector.shape_cast %10 : vector<40xf32> to vector<40x1xf32>
    %cst_6 = arith.constant 3.906250e-03 : f32
    %12 = vector.broadcast %cst_6 : f32 to vector<40x1xf32>
    %13 = arith.mulf %11, %12 : vector<40x1xf32>
    %c0_7 = arith.constant 0 : index
    %c0_8 = arith.constant 0 : index
    %14 = vector.load %arg2[%c0_7, %c0_8] : memref<40x2xf32, #tpu.memory_space<vmem>>, vector<40x1xf32>
    %c0_9 = arith.constant 0 : index
    %c1 = arith.constant 1 : index
    %15 = vector.load %arg2[%c0_9, %c1] : memref<40x2xf32, #tpu.memory_space<vmem>>, vector<40x1xf32>
    %cst_10 = arith.constant 1.000000e-03 : f32
    %16 = vector.broadcast %cst_10 : f32 to vector<40x1xf32>
    %17 = arith.addf %13, %16 : vector<40x1xf32>
    %18 = math.rsqrt %17 : vector<40x1xf32>
    %19 = arith.mulf %14, %18 : vector<40x1xf32>
    %20 = vector.broadcast %19 : vector<40x1xf32> to vector<40x256xf32>
    %21 = arith.mulf %8, %20 : vector<40x256xf32>
    %22 = vector.broadcast %15 : vector<40x1xf32> to vector<40x256xf32>
    %23 = arith.addf %21, %22 : vector<40x256xf32>
    %c0_11 = arith.constant 0 : index
    %c0_12 = arith.constant 0 : index
    %24 = vector.load %arg3[%c0_11, %c0_12] : memref<40x256xf32, #tpu.memory_space<vmem>>, vector<40x256xf32>
    tpu.vector_store %arg3[%c0_11, %c0_12], %23 {strides = array<i32>} : memref<40x256xf32, #tpu.memory_space<vmem>>, vector<40x256xf32>,
    return
  }
}

</mosaic_0001>

<bundles_post_ra>
// kernel: tpu_custom_call.1
= control target key start
LH: loop header
LB: loop body
LE: loop exit
PB: predicated region body
PF: predicated region fallthrough
CT: control target
= control target key end

     0   :  { %8 = vsyncpa [#allocation3], 0  ;;  %s733_s0 = inlined_call_operand.hbm [shape: f32[240,256], index: 0, kind: input, shape index: {}]   ;;  %s734_s1 = inlined_call_operand.hbm [shape: f32[40,240], index: 1, kind: input, shape index: {}]   ;;  %s735_s2 = inlined_call_operand.vmem [shape: f32[40,2], index: 2, kind: input, shape index: {}]   ;;  %s736_s3 = inlined_call_operand.hbm [shape: f32[40,256], index: 3, kind: output, shape index: {}]  }
   0x1   :  { %9 = vsyncpa [#allocation6], 0 }
   0x2   :  { %10 = vsyncpa [#allocation4], 0  ;;  %s591_s12 = smov [#allocation2]   ;;  %s519_s16 = scalar_lea.hbm %s733_s0, 7680 }
   0x3   :  { %s16_s13 = sshll.u32 %s591_s12, 4  ;;  %p520_p0 = scmp.ne.s32.totalorder %s733_s0, %s519_s16  ;;  %s17_s13 = int_to_ptr.vmem [resolvable:$true] %s16_s13 }
   0x4   :  { %p523_p1 = scmp.lt.u32.totalorder %s519_s16, %s733_s0 }
   0x6   :  { %p525_p2 = pnand %p523_p1, %p520_p0 }
   0x8   :  { %528 = shalt.err (!%p525_p2)
}
   0x9   :  { %s529_s21 = scalar_lea.vmem %s17_s13, 7680  ;;  %p534_p4 = scmp.lt.s32.totalorder %s17_s13, %s17_s13 }
   0xa   :  { %p530_p3 = scmp.ne.s32.totalorder %s17_s13, %s529_s21  ;;  %p535_p5 = scmp.lt.s32.totalorder %s529_s21, %s529_s21 }
   0xc   :  { %p536_p6 = por %p535_p5, %p534_p4 }
   0xe   :  { %p537_p7 = pnand %p536_p6, %p530_p3 }
  0x10   :  { %540 = shalt.err (!%p537_p7)
}
  0x11   :  { %s592_s22 = smov 256   ;;  %s593_s23 = smov 16  }
  0x12   :  { %22 = dma.hbm_to_vmem [thread:$0]  %s733_s0, 7680, %s17_s13, [#allocation3], %s592_s22, %s592_s22, %s593_s23  }
  0x13   :  { %s594_s26 = smov [#allocation5]   ;;  %s541_s30 = scalar_lea.hbm %s734_s1, 1280 }
  0x14   :  { %s28_s27 = sshll.u32 %s594_s26, 4  ;;  %p542_p8 = scmp.ne.s32.totalorder %s734_s1, %s541_s30  ;;  %s29_s27 = int_to_ptr.vmem [resolvable:$true] %s28_s27 }
  0x15   :  { %p545_p9 = scmp.lt.u32.totalorder %s541_s30, %s734_s1 }
  0x17   :  { %p547_p10 = pnand %p545_p9, %p542_p8 }
  0x19   :  { %550 = shalt.err (!%p547_p10)
}
  0x1a   :  { %s551_s8 = scalar_lea.vmem %s29_s27, 1280  ;;  %p556_p12 = scmp.lt.s32.totalorder %s29_s27, %s29_s27 }
  0x1b   :  { %p552_p11 = scmp.ne.s32.totalorder %s29_s27, %s551_s8  ;;  %p557_p13 = scmp.lt.s32.totalorder %s551_s8, %s551_s8 }
  0x1d   :  { %p558_p0 = por %p557_p13, %p556_p12 }
  0x1f   :  { %p559_p1 = pnand %p558_p0, %p552_p11 }
  0x21   :  { %562 = shalt.err (!%p559_p1)
}
  0x22   :  { %34 = dma.hbm_to_vmem [thread:$0]  %s734_s1, 1280, %s29_s27, [#allocation6], %s592_s22, %s592_s22, %s593_s23  }
  0x23   :  { %585 = dma.done.wait [#allocation3], 7680  }
  0x24   :  { %586 = vsyncadd [#allocation3], 4294959616 }
  0x25   :  { %587 = dma.done.wait [#allocation6], 1280  }
  0x26   :  { %588 = vsyncadd [#allocation6], 4294966016  ;;  %v44_v0 = vld [vmem:[#allocation2 + $0x8] sm:$0xff]  ;;  %v46_v1 = vld [vmem:[#allocation2 + $0x18] sm:$0xff]  ;;  %vm113_vm0 = vcmask 916480  }
  0x27   :  { %v43_v2 = vld [vmem:[#allocation2] sm:$0xff]  ;;  %v407_v3 = vpack.c.bf16 %v46_v1, %v44_v0  ;;  %v45_v4 = vld [vmem:[#allocation2 + $0x10] sm:$0xff]  ;;  %v48_v5 = vld [vmem:[#allocation2 + $0x28] sm:$0xff] }
  0x28   :  { %v50_v6 = vld [vmem:[#allocation2 + $0x38] sm:$0xff]  ;;  %v409_v7 = vpack.c.bf16 %v45_v4, %v43_v2  ;;  %v47_v9 = vld [vmem:[#allocation2 + $0x20] sm:$0xff]  ;;  %v49_v10 = vld [vmem:[#allocation2 + $0x30] sm:$0xff] }
  0x29   :  { %v411_v8 = vpack.c.bf16 %v50_v6, %v48_v5  ;;  %v52_v11 = vld [vmem:[#allocation2 + $0x48] sm:$0xff]  ;;  %408 = vmatprep.subr.bf16.mxu0 %v407_v3  ;;  %467 = vmatprep.subr.bf16.mxu1 %v407_v3  ;;  %v54_v12 = vld [vmem:[#allocation2 + $0x58] sm:$0xff]  ;;  %v413_v13 = vpack.c.bf16 %v49_v10, %v47_v9  ;;  %v51_v15 = vld [vmem:[#allocation2 + $0x40] sm:$0xff] }
  0x2a   :  { %410 = vmatpush1.bf16.msra.mxu0 %v409_v7  ;;  %482 = vmatpush1.bf16.msra.mxu1 %v409_v7  ;;  %v415_v14 = vpack.c.bf16 %v54_v12, %v52_v11  ;;  %v53_v16 = vld [vmem:[#allocation2 + $0x50] sm:$0xff]  ;;  %v56_v17 = vld [vmem:[#allocation2 + $0x68] sm:$0xff]  ;;  %v58_v18 = vld [vmem:[#allocation2 + $0x78] sm:$0xff] }
  0x2b   :  { %412 = vmatprep.subr.bf16.mxu0 %v411_v8  ;;  %468 = vmatprep.subr.bf16.mxu1 %v411_v8  ;;  %v417_v19 = vpack.c.bf16 %v53_v16, %v51_v15  ;;  %v419_v20 = vpack.c.bf16 %v58_v18, %v56_v17  ;;  %v55_v21 = vld [vmem:[#allocation2 + $0x60] sm:$0xff]  ;;  %v57_v22 = vld [vmem:[#allocation2 + $0x70] sm:$0xff]  ;;  %v60_v23 = vld [vmem:[#allocation2 + $0x88] sm:$0xff] }
  0x2c   :  { %v62_v24 = vld [vmem:[#allocation2 + $0x98] sm:$0xff]  ;;  %v421_v25 = vpack.c.bf16 %v57_v22, %v55_v21  ;;  %v59_v27 = vld [vmem:[#allocation2 + $0x80] sm:$0xff]  ;;  %v61_v28 = vld [vmem:[#allocation2 + $0x90] sm:$0xff] }
  0x2d   :  { %v423_v26 = vpack.c.bf16 %v62_v24, %v60_v23  ;;  %v64_v29 = vld [vmem:[#allocation2 + $0xa8] sm:$0xff]  ;;  %v66_v30 = vld [vmem:[#allocation2 + $0xb8] sm:$0xff]  ;;  %v425_v31 = vpack.c.bf16 %v61_v28, %v59_v27  ;;  %v63_v33 = vld [vmem:[#allocation2 + $0xa0] sm:$0xff] }
  0x2e   :  { %414 = vmatpush1.bf16.msra.mxu0 %v413_v13  ;;  %483 = vmatpush1.bf16.msra.mxu1 %v413_v13  ;;  %v427_v32 = vpack.c.bf16 %v66_v30, %v64_v29  ;;  %v65_v34 = vld [vmem:[#allocation2 + $0xb0] sm:$0xff]  ;;  %v68_v35 = vld [vmem:[#allocation2 + $0xc8] sm:$0xff]  ;;  %v70_v36 = vld [vmem:[#allocation2 + $0xd8] sm:$0xff] }
  0x2f   :  { %416 = vmatprep.subr.bf16.mxu0 %v415_v14  ;;  %469 = vmatprep.subr.bf16.mxu1 %v415_v14  ;;  %v429_v37 = vpack.c.bf16 %v65_v34, %v63_v33  ;;  %v104_v38 = vld [vmem:[#allocation5 + $0x8] sm:$0xff]  ;;  %v431_v39 = vpack.c.bf16 %v70_v36, %v68_v35  ;;  %v67_v40 = vld [vmem:[#allocation2 + $0xc0] sm:$0xff]  ;;  %v69_v41 = vld [vmem:[#allocation2 + $0xd0] sm:$0xff] }
  0x30   :  { %v110_v42 = vld [vmem:[#allocation5 + $0x38] sm:$0xff]  ;;  %v72_v43 = vld [vmem:[#allocation2 + $0xe8] sm:$0xff]  ;;  %402 = vmatprep.mubr.msk.f32.mxu0 %vm113_vm0, %v104_v38  ;;  %v433_v45 = vpack.c.bf16 %v69_v41, %v67_v40  ;;  %v71_v47 = vld [vmem:[#allocation2 + $0xe0] sm:$0xff] }
  0x31   :  { %v74_v44 = vld [vmem:[#allocation2 + $0xf8] sm:$0xff]  ;;  %405 = vmatprep.mubr.msk.f32.mxu1 %vm113_vm0, %v110_v42  ;;  %v73_v48 = vld [vmem:[#allocation2 + $0xf0] sm:$0xff]  ;;  %v76_v49 = vld [vmem:[#allocation2 + $0x108] sm:$0xff] }
  0x32   :  { %418 = vmatpush1.bf16.msra.mxu0 %v417_v19  ;;  %484 = vmatpush1.bf16.msra.mxu1 %v417_v19  ;;  %v435_v46 = vpack.c.bf16 %v74_v44, %v72_v43  ;;  %v78_v50 = vld [vmem:[#allocation2 + $0x118] sm:$0xff]  ;;  %v437_v51 = vpack.c.bf16 %v73_v48, %v71_v47  ;;  %v75_v53 = vld [vmem:[#allocation2 + $0x100] sm:$0xff]  ;;  %v77_v54 = vld [vmem:[#allocation2 + $0x110] sm:$0xff] }
  0x33   :  { %420 = vmatprep.subr.bf16.mxu0 %v419_v20  ;;  %470 = vmatprep.subr.bf16.mxu1 %v419_v20  ;;  %v439_v52 = vpack.c.bf16 %v78_v50, %v76_v49  ;;  %v80_v55 = vld [vmem:[#allocation2 + $0x128] sm:$0xff]  ;;  %v82_v56 = vld [vmem:[#allocation2 + $0x138] sm:$0xff]  ;;  %v441_v57 = vpack.c.bf16 %v77_v54, %v75_v53  ;;  %v79_v59 = vld [vmem:[#allocation2 + $0x120] sm:$0xff] }
  0x34   :  { %v443_v58 = vpack.c.bf16 %v82_v56, %v80_v55  ;;  %v81_v60 = vld [vmem:[#allocation2 + $0x130] sm:$0xff]  ;;  %v84_v61 = vld [vmem:[#allocation2 + $0x148] sm:$0xff]  ;;  %v86_v62 = vld [vmem:[#allocation2 + $0x158] sm:$0xff] }
  0x35   :  { %v445_v63 = vpack.c.bf16 %v81_v60, %v79_v59  ;;  %v447_v0 = vpack.c.bf16 %v86_v62, %v84_v61  ;;  %v83_v1 = vld [vmem:[#allocation2 + $0x140] sm:$0xff]  ;;  %v85_v2 = vld [vmem:[#allocation2 + $0x150] sm:$0xff]  ;;  %v88_v3 = vld [vmem:[#allocation2 + $0x168] sm:$0xff] }
  0x36   :  { %422 = vmatpush1.bf16.msra.mxu0 %v421_v25  ;;  %485 = vmatpush1.bf16.msra.mxu1 %v421_v25  ;;  %v90_v4 = vld [vmem:[#allocation2 + $0x178] sm:$0xff]  ;;  %v449_v5 = vpack.c.bf16 %v85_v2, %v83_v1  ;;  %v87_v7 = vld [vmem:[#allocation2 + $0x160] sm:$0xff]  ;;  %v89_v8 = vld [vmem:[#allocation2 + $0x170] sm:$0xff] }
  0x37   :  { %424 = vmatprep.subr.bf16.mxu0 %v423_v26  ;;  %471 = vmatprep.subr.bf16.mxu1 %v423_v26  ;;  %v451_v6 = vpack.c.bf16 %v90_v4, %v88_v3  ;;  %v92_v9 = vld [vmem:[#allocation2 + $0x188] sm:$0xff]  ;;  %v94_v10 = vld [vmem:[#allocation2 + $0x198] sm:$0xff]  ;;  %v453_v11 = vpack.c.bf16 %v89_v8, %v87_v7  ;;  %v91_v13 = vld [vmem:[#allocation2 + $0x180] sm:$0xff] }
  0x38   :  { %v455_v12 = vpack.c.bf16 %v94_v10, %v92_v9  ;;  %v93_v14 = vld [vmem:[#allocation2 + $0x190] sm:$0xff]  ;;  %v96_v15 = vld [vmem:[#allocation2 + $0x1a8] sm:$0xff]  ;;  %v98_v16 = vld [vmem:[#allocation2 + $0x1b8] sm:$0xff] }
  0x39   :  { %v457_v17 = vpack.c.bf16 %v93_v14, %v91_v13  ;;  %v459_v18 = vpack.c.bf16 %v98_v16, %v96_v15  ;;  %v95_v19 = vld [vmem:[#allocation2 + $0x1a0] sm:$0xff]  ;;  %v97_v20 = vld [vmem:[#allocation2 + $0x1b0] sm:$0xff]  ;;  %v100_v21 = vld [vmem:[#allocation2 + $0x1c8] sm:$0xff] }
  0x3a   :  { %426 = vmatpush1.bf16.msra.mxu0 %v425_v31  ;;  %486 = vmatpush1.bf16.msra.mxu1 %v425_v31  ;;  %v102_v22 = vld [vmem:[#allocation2 + $0x1d8] sm:$0xff]  ;;  %v461_v23 = vpack.c.bf16 %v97_v20, %v95_v19  ;;  %v99_v25 = vld [vmem:[#allocation2 + $0x1c0] sm:$0xff]  ;;  %v101_v26 = vld [vmem:[#allocation2 + $0x1d0] sm:$0xff] }
  0x3b   :  { %428 = vmatprep.subr.bf16.mxu0 %v427_v32  ;;  %472 = vmatprep.subr.bf16.mxu1 %v427_v32  ;;  %v463_v24 = vpack.c.bf16 %v102_v22, %v100_v21  ;;  %v465_v27 = vpack.c.bf16 %v101_v26, %v99_v25  ;;  %v103_v28 = vld [vmem:[#allocation5] sm:$0xff]  ;;  %v109_v29 = vld [vmem:[#allocation5 + $0x30] sm:$0xff]  ;;  %v106_v30 = vld [vmem:[#allocation5 + $0x18] sm:$0xff]  ;;  %v595_v22 = vmov 1   ;;  %v596_v25 = vmov 0  }
  0x3c   :  { %v112_v31 = vld [vmem:[#allocation5 + $0x48] sm:$0xff]  ;;  %v105_v32 = vld [vmem:[#allocation5 + $0x10] sm:$0xff]  ;;  %v111_v33 = vld [vmem:[#allocation5 + $0x40] sm:$0xff]  ;;  %504 = vset.pattern.permute.xlu1 %v595_v22  ;;  %505 = vset.pattern.permute.xlu0 %v596_v25 }
  0x3d   :  { %v108_v34 = vld [vmem:[#allocation5 + $0x28] sm:$0xff]  ;;  %v107_v35 = vld [vmem:[#allocation5 + $0x20] sm:$0xff]  ;;  %v286_v26 = vld [vmem:[%s735_s2 + $0x10] sm:$0xff] }
  0x3e   :  { %430 = vmatpush1.bf16.msra.mxu0 %v429_v37  ;;  %487 = vmatpush1.bf16.msra.mxu1 %v429_v37 }
  0x3f   :  { %432 = vmatprep.subr.bf16.mxu0 %v431_v39  ;;  %473 = vmatprep.subr.bf16.mxu1 %v431_v39 }
  0x42   :  { %434 = vmatpush1.bf16.msra.mxu0 %v433_v45  ;;  %488 = vmatpush1.bf16.msra.mxu1 %v433_v45 }
  0x43   :  { %436 = vmatprep.subr.bf16.mxu0 %v435_v46  ;;  %474 = vmatprep.subr.bf16.mxu1 %v435_v46 }
  0x46   :  { %438 = vmatpush1.bf16.msra.mxu0 %v437_v51  ;;  %489 = vmatpush1.bf16.msra.mxu1 %v437_v51 }
  0x47   :  { %440 = vmatprep.subr.bf16.mxu0 %v439_v52  ;;  %475 = vmatprep.subr.bf16.mxu1 %v439_v52 }
  0x4a   :  { %442 = vmatpush1.bf16.msra.mxu0 %v441_v57  ;;  %490 = vmatpush1.bf16.msra.mxu1 %v441_v57 }
  0x4b   :  { %444 = vmatprep.subr.bf16.mxu0 %v443_v58  ;;  %476 = vmatprep.subr.bf16.mxu1 %v443_v58 }
  0x4e   :  { %446 = vmatpush1.bf16.msra.mxu0 %v445_v63  ;;  %491 = vmatpush1.bf16.msra.mxu1 %v445_v63 }
  0x4f   :  { %448 = vmatprep.subr.bf16.mxu0 %v447_v0  ;;  %477 = vmatprep.subr.bf16.mxu1 %v447_v0 }
  0x52   :  { %450 = vmatpush1.bf16.msra.mxu0 %v449_v5  ;;  %492 = vmatpush1.bf16.msra.mxu1 %v449_v5 }
  0x53   :  { %452 = vmatprep.subr.bf16.mxu0 %v451_v6  ;;  %478 = vmatprep.subr.bf16.mxu1 %v451_v6 }
  0x56   :  { %454 = vmatpush1.bf16.msra.mxu0 %v453_v11  ;;  %493 = vmatpush1.bf16.msra.mxu1 %v453_v11 }
  0x57   :  { %456 = vmatprep.subr.bf16.mxu0 %v455_v12  ;;  %479 = vmatprep.subr.bf16.mxu1 %v455_v12 }
  0x5a   :  { %458 = vmatpush1.bf16.msra.mxu0 %v457_v17  ;;  %494 = vmatpush1.bf16.msra.mxu1 %v457_v17 }
  0x5b   :  { %460 = vmatprep.subr.bf16.mxu0 %v459_v18  ;;  %480 = vmatprep.subr.bf16.mxu1 %v459_v18 }
  0x5e   :  { %462 = vmatpush1.bf16.msra.mxu0 %v461_v23  ;;  %495 = vmatpush1.bf16.msra.mxu1 %v461_v23  ;;  %v284_v23 = vld [vmem:[%s735_s2] sm:$0xff] }
  0x5f   :  { %464 = vmatprep.subr.bf16.mxu0 %v463_v24  ;;  %481 = vmatprep.subr.bf16.mxu1 %v463_v24  ;;  %v285_v24 = vld [vmem:[%s735_s2 + $0x8] sm:$0xff] }
  0x62   :  { %466 = vmatpush1.bf16.msra.mxu0 %v465_v27  ;;  %496 = vmatpush1.bf16.msra.mxu1 %v465_v27 }
  0x65   :  { %194 = vmatmul.mubr.f32.vlgmr.msra.gmra.mrb[0].mxu0 %v103_v28  ;;  %212 = vmatmul.mubr.f32.vlgmr.msra.gmra.mrb[0].mxu1 %v109_v29 }
  0x66   :  { %403 = vmatprep.mubr.msk.f32.mxu0 %vm113_vm0, %v106_v30  ;;  %406 = vmatprep.mubr.msk.f32.mxu1 %vm113_vm0, %v112_v31 }
  0x69   :  { %200 = vmatmul.mubr.f32.gmra.mrb[2].mxu0 %v105_v32  ;;  %218 = vmatmul.mubr.f32.gmra.mrb[2].mxu1 %v111_v33 }
  0x6a   :  { %404 = vmatprep.mubr.msk.f32.mxu0 %vm113_vm0, %v108_v34 }
  0x6d   :  { %206 = vmatmul.mubr.f32.gmra.mrb[4].mxu0 %v107_v35 }
 0x138   :  { %v195_v36 = vpop.f32.mrb[0].mxu0  ;;  %v213_v37 = vpop.f32.mrb[0].mxu1 }
 0x139   :  { %v197_v38 = vpop.f32.mrb[1].mxu0  ;;  %v215_v39 = vpop.f32.mrb[1].mxu1 }
 0x13a   :  { %v224_v40 = vadd.f32 %v197_v38, %v195_v36  ;;  %v233_v41 = vadd.f32 %v215_v39, %v213_v37 }
 0x13c   :  { %225 = vadd.xlane.f32.xlu0 %v224_v40  ;;  %v201_v42 = vpop.f32.mrb[2].mxu0  ;;  %v219_v43 = vpop.f32.mrb[2].mxu1 }
 0x13d   :  { %v203_v44 = vpop.f32.mrb[3].mxu0  ;;  %v221_v45 = vpop.f32.mrb[3].mxu1 }
 0x13e   :  { %v227_v46 = vadd.f32 %v203_v44, %v201_v42  ;;  %v236_v47 = vadd.f32 %v221_v45, %v219_v43 }
 0x140   :  { %228 = vadd.xlane.f32.xlu0 %v227_v46  ;;  %v207_v48 = vpop.f32.mrb[4].mxu0 }
 0x141   :  { %v209_v49 = vpop.f32.mrb[5].mxu0 }
 0x142   :  { %v230_v50 = vadd.f32 %v209_v49, %v207_v48 }
 0x144   :  { %237 = vadd.xlane.f32.xlu0 %v236_v47  ;;  %231 = vadd.xlane.f32.xlu1 %v230_v50 }
 0x148   :  { %234 = vadd.xlane.f32.xlu1 %v233_v41 }
 0x1c9   :  { %v226_v51 = vpop.xlane.xlu0 %225 }
 0x1ca   :  { %v239_v52 = vmul.f32 0.00390625, %v226_v51 }
 0x1cc   :  { %v653_v53 = vsub.f32 %v195_v36, %v239_v52  ;;  %v655_v54 = vsub.f32 %v197_v38, %v239_v52 }
 0x1cd   :  { %v229_v55 = vpop.xlane.xlu0 %228 }
 0x1ce   :  { %v240_v56 = vmul.f32 0.00390625, %v229_v55  ;;  %v254_v57 = vmul.f32 %v653_v53, %v653_v53  ;;  %v255_v58 = vmul.f32 %v655_v54, %v655_v54 }
 0x1d0   :  { %v661_v59 = vsub.f32 %v201_v42, %v240_v56  ;;  %v663_v60 = vsub.f32 %v203_v44, %v240_v56  ;;  %v264_v61 = vadd.f32 %v255_v58, %v254_v57 }
 0x1d1   :  { %v238_v62 = vpop.xlane.xlu0 %237  ;;  %v232_v63 = vpop.xlane.xlu1 %231 }
 0x1d2   :  { %v243_v0 = vmul.f32 0.00390625, %v238_v62  ;;  %v241_v1 = vmul.f32 0.00390625, %v232_v63  ;;  %265 = vadd.xlane.f32.xlu1 %v264_v61  ;;  %v256_v2 = vmul.f32 %v661_v59, %v661_v59  ;;  %v257_v3 = vmul.f32 %v663_v60, %v663_v60 }
 0x1d4   :  { %v669_v4 = vsub.f32 %v219_v43, %v243_v0  ;;  %v671_v5 = vsub.f32 %v221_v45, %v243_v0  ;;  %v673_v6 = vsub.f32 %v207_v48, %v241_v1  ;;  %v675_v7 = vsub.f32 %v209_v49, %v241_v1  ;;  %v288_v43 = vld [vmem:[%s735_s2 + $0x20] sm:$0xff]  ;;  %v287_v45 = vld [vmem:[%s735_s2 + $0x18] sm:$0xff]  ;;  %s597_s2 = smov [#allocation7]  }
 0x1d5   :  { %v235_v8 = vpop.xlane.xlu1 %234  ;;  %v267_v9 = vadd.f32 %v257_v3, %v256_v2  ;;  %s389_s19 = sshll.u32 %s597_s2, 4  ;;  %s390_s19 = int_to_ptr.vmem [resolvable:$true] %s389_s19 }
 0x1d6   :  { %v242_v10 = vmul.f32 0.00390625, %v235_v8  ;;  %v258_v11 = vmul.f32 %v673_v6, %v673_v6  ;;  %v259_v12 = vmul.f32 %v675_v7, %v675_v7  ;;  %v262_v13 = vmul.f32 %v669_v4, %v669_v4  ;;  %s563_s20 = scalar_lea.vmem %s390_s19, 1280  ;;  %p568_p3 = scmp.lt.s32.totalorder %s390_s19, %s390_s19 }
 0x1d7   :  { %268 = vadd.xlane.f32.xlu0 %v267_v9  ;;  %v263_v17 = vmul.f32 %v671_v5, %v671_v5  ;;  %p564_p2 = scmp.ne.s32.totalorder %s390_s19, %s563_s20  ;;  %p569_p4 = scmp.lt.s32.totalorder %s563_s20, %s563_s20 }
 0x1d8   :  { %v683_v14 = vsub.f32 %v213_v37, %v242_v10  ;;  %v685_v15 = vsub.f32 %v215_v39, %v242_v10  ;;  %v270_v16 = vadd.f32 %v259_v12, %v258_v11 }
 0x1d9   :  { %v276_v20 = vadd.f32 %v263_v17, %v262_v13  ;;  %p570_p5 = por %p569_p4, %p568_p3 }
 0x1da   :  { %271 = vadd.xlane.f32.xlu1 %v270_v16  ;;  %v260_v18 = vmul.f32 %v683_v14, %v683_v14  ;;  %v261_v19 = vmul.f32 %v685_v15, %v685_v15 }
 0x1db   :  { %p571_p6 = pnand %p570_p5, %p564_p2 }
 0x1dc   :  { %v273_v21 = vadd.f32 %v261_v19, %v260_v18 }
 0x1de   :  { %277 = vadd.xlane.f32.xlu1 %v276_v20  ;;  %274 = vadd.xlane.f32.xlu0 %v273_v21 }
 0x1ef   :  { %341 = vperm.xlu1 %504, %v284_v23  }
 0x1f3   :  { %346 = vperm.xlu1 %504, %v285_v24  }
 0x1f7   :  { %351 = vperm.xlu1 %504, %v286_v26  }
 0x1fb   :  { %506 = vset.pattern.permute.xlu1 %v596_v25 }
 0x25f   :  { %v266_v27 = vpop.xlane.xlu1 %265 }
 0x260   :  { %v279_v28 = vmul.f32 0.00390625, %v266_v27 }
 0x262   :  { %v289_v29 = vadd.f32 0.001, %v279_v28 }
 0x264   :  { %509 = vrsqrt.f32 %v289_v29  ;;  %v269_v30 = vpop.xlane.xlu0 %268 }
 0x265   :  { %v280_v32 = vmul.f32 0.00390625, %v269_v30 }
 0x267   :  { %v272_v31 = vpop.xlane.xlu1 %271  ;;  %v290_v37 = vadd.f32 0.001, %v280_v32 }
 0x268   :  { %v281_v41 = vmul.f32 0.00390625, %v272_v31 }
 0x26a   :  { %v291_v44 = vadd.f32 0.001, %v281_v41 }
 0x26b   :  { %v275_v33 = vpop.xlane.xlu0 %274  ;;  %v278_v34 = vpop.xlane.xlu1 %277 }
 0x26c   :  { %v282_v35 = vmul.f32 0.00390625, %v275_v33  ;;  %v283_v39 = vmul.f32 0.00390625, %v278_v34 }
 0x26e   :  { %v510_v36 = vpop.eup %509  ;;  %v292_v38 = vadd.f32 0.001, %v282_v35  ;;  %v293_v42 = vadd.f32 0.001, %v283_v39 }
 0x26f   :  { %v299_v40 = vmul.f32 %v510_v36, %v284_v23  ;;  %v342_v56 = vpop.permute.xlu1 %341 }
 0x270   :  { %511 = vrsqrt.f32 %v292_v38 }
 0x271   :  { %306 = vperm.xlu0 %505, %v299_v40   ;;  %513 = vrsqrt.f32 %v290_v37 }
 0x272   :  { %515 = vrsqrt.f32 %v293_v42 }
 0x273   :  { %517 = vrsqrt.f32 %v291_v44  ;;  %v347_v62 = vpop.permute.xlu1 %346 }
 0x275   :  { %508 = vset.pattern.permute.xlu0 %v595_v22 }
 0x276   :  { %361 = vperm.xlu0 %508, %v288_v43  }
 0x277   :  { %v352_v1 = vpop.permute.xlu1 %351 }
 0x27a   :  { %v512_v46 = vpop.eup %511 }
 0x27b   :  { %v302_v47 = vmul.f32 %v512_v46, %v287_v45  ;;  %v514_v48 = vpop.eup %513 }
 0x27c   :  { %v300_v49 = vmul.f32 %v514_v48, %v285_v24  ;;  %v516_v50 = vpop.eup %515 }
 0x27d   :  { %321 = vperm.xlu1 %506, %v302_v47   ;;  %v303_v51 = vmul.f32 %v516_v50, %v288_v43  ;;  %v518_v52 = vpop.eup %517 }
 0x27e   :  { %v301_v55 = vmul.f32 %v518_v52, %v286_v26 }
 0x281   :  { %311 = vperm.xlu1 %506, %v300_v49  }
 0x285   :  { %326 = vperm.xlu1 %506, %v303_v51  }
 0x289   :  { %316 = vperm.xlu1 %506, %v301_v55  }
 0x28d   :  { %507 = vset.pattern.permute.xlu1 %v595_v22 }
 0x28e   :  { %356 = vperm.xlu1 %507, %v287_v45  }
 0x2f0   :  { %v307_v57 = vpop.permute.xlu0 %306 }
 0x2f1   :  { %v329_v58 = vmul.f32 %v307_v57, %v653_v53  ;;  %v330_v61 = vmul.f32 %v307_v57, %v655_v54 }
 0x2f3   :  { %v364_v63 = vadd.f32 %v342_v56, %v329_v58  ;;  %v365_v0 = vadd.f32 %v342_v56, %v330_v61 }
 0x2f5   :  { %374 = vst [vmem:[#allocation7] sm:$0xff] %v364_v63  ;;  %375 = vst [vmem:[#allocation7 + $0x8] sm:$0xff] %v365_v0  ;;  %v362_v13 = vpop.permute.xlu0 %361 }
 0x2fc   :  { %v322_v2 = vpop.permute.xlu1 %321 }
 0x2fd   :  { %v335_v21 = vmul.f32 %v322_v2, %v683_v14  ;;  %v336_v22 = vmul.f32 %v322_v2, %v685_v15 }
 0x300   :  { %v312_v3 = vpop.permute.xlu1 %311 }
 0x301   :  { %v331_v8 = vmul.f32 %v312_v3, %v661_v59  ;;  %v332_v9 = vmul.f32 %v312_v3, %v663_v60 }
 0x303   :  { %v366_v10 = vadd.f32 %v347_v62, %v331_v8  ;;  %v367_v11 = vadd.f32 %v347_v62, %v332_v9 }
 0x304   :  { %v327_v12 = vpop.permute.xlu1 %326 }
 0x305   :  { %376 = vst [vmem:[#allocation7 + $0x10] sm:$0xff] %v366_v10  ;;  %377 = vst [vmem:[#allocation7 + $0x18] sm:$0xff] %v367_v11  ;;  %v337_v53 = vmul.f32 %v327_v12, %v669_v4  ;;  %v338_v54 = vmul.f32 %v327_v12, %v671_v5 }
 0x307   :  { %v372_v16 = vadd.f32 %v362_v13, %v337_v53  ;;  %v373_v17 = vadd.f32 %v362_v13, %v338_v54 }
 0x308   :  { %v317_v18 = vpop.permute.xlu1 %316 }
 0x309   :  { %382 = vst [vmem:[#allocation7 + $0x40] sm:$0xff] %v372_v16  ;;  %383 = vst [vmem:[#allocation7 + $0x48] sm:$0xff] %v373_v17  ;;  %v333_v19 = vmul.f32 %v317_v18, %v673_v6  ;;  %v334_v59 = vmul.f32 %v317_v18, %v675_v7 }
 0x30b   :  { %v368_v60 = vadd.f32 %v352_v1, %v333_v19  ;;  %v369_v20 = vadd.f32 %v352_v1, %v334_v59 }
 0x30d   :  { %378 = vst [vmem:[#allocation7 + $0x20] sm:$0xff] %v368_v60  ;;  %379 = vst [vmem:[#allocation7 + $0x28] sm:$0xff] %v369_v20  ;;  %v357_v4 = vpop.permute.xlu1 %356 }
 0x30e   :  { %v370_v5 = vadd.f32 %v357_v4, %v335_v21  ;;  %v371_v23 = vadd.f32 %v357_v4, %v336_v22 }
 0x310   :  { %380 = vst [vmem:[#allocation7 + $0x30] sm:$0xff] %v370_v5  ;;  %381 = vst [vmem:[#allocation7 + $0x38] sm:$0xff] %v371_v23 }
 0x311   :  { %574 = shalt.err (!%p571_p6)
}
 0x312   :  { %s575_s25 = scalar_lea.hbm %s736_s3, 1280 }
 0x313   :  { %p576_p7 = scmp.ne.s32.totalorder %s736_s3, %s575_s25  ;;  %p579_p8 = scmp.lt.u32.totalorder %s575_s25, %s736_s3 }
 0x315   :  { %p581_p9 = pnand %p579_p8, %p576_p7 }
 0x317   :  { %584 = shalt.err (!%p581_p9)
}
 0x318   :  { %395 = dma.vmem_to_hbm [thread:$0]  %s390_s19, 1280, %s736_s3, [#allocation4], %s592_s22, %s592_s22, %s593_s23  }
 0x319   :  { %589 = dma.done.wait [#allocation4], 1280  }
 0x31a   :  { %590 = vsyncadd [#allocation4], 4294966016 }
 0x31b   :  { %399 = vsyncpa [#allocation3], 1 }
 0x31c   :  { %400 = vsyncpa [#allocation6], 1 }
 0x31d   :  { %401 = vsyncpa [#allocation4], 1 }

</bundles_post_ra>
